<compile_context>
chip_gen: v6e
topology: v6e:2x2x1
jax: 0.10.0
libtpu: 0.0.40
codegen_flags: <defaults>
</compile_context>

<pallas_src>
import functools

import jax
import jax.numpy as jnp
from jax.experimental import pallas as pl
from jax.experimental.pallas import tpu as pltpu

LEAKY_SLOPE = 0.01  # torch.nn.functional.leaky_relu default negative_slope
LN_EPS = 1e-5       # torch.nn.LayerNorm default eps


# ---------------------------------------------------------------------------
# Chip heuristics (wrapped defensively; defaults are safe everywhere)
# ---------------------------------------------------------------------------
def _device_kind():
    try:
        return jax.devices()[0].device_kind.lower()
    except Exception:
        return ""


def _mxu_tile():
    """MXU weight-tile edge: 128 on <=v5 generations, 256 on v6e/v7x."""
    kind = _device_kind()
    for tag in ("v2", "v3", "v4", "v5"):
        if tag in kind:
            return 128
    return 256


def _num_tensorcores():
    """TensorCores visible to one Pallas grid: 2 on v7x, else 1."""
    return 2 if "v7" in _device_kind() else 1


# ---------------------------------------------------------------------------
# Kernel
# ---------------------------------------------------------------------------
def _twin_ln_leaky(z, gamma, beta, m1, inv_n):
    """LayerNorm over each half of the last axis (branch-1 lanes where m1==1,
    branch-2 lanes where m1==0), followed by leaky_relu.  Branch-2 statistics
    are derived as (total - branch1); all math is f32."""
    s1 = jnp.sum(z * m1, axis=-1, keepdims=True)
    st = jnp.sum(z, axis=-1, keepdims=True)
    zsq = z * z
    q1 = jnp.sum(zsq * m1, axis=-1, keepdims=True)
    qt = jnp.sum(zsq, axis=-1, keepdims=True)

    mean1 = s1 * inv_n
    mean2 = (st - s1) * inv_n
    msq1 = q1 * inv_n
    msq2 = (qt - q1) * inv_n

    # Clamp: E[x^2] - mean^2 can go slightly negative from f32 cancellation.
    var1 = jnp.maximum(msq1 - mean1 * mean1, 0.0)
    var2 = jnp.maximum(msq2 - mean2 * mean2, 0.0)

    mean = mean2 + (mean1 - mean2) * m1
    inv = jax.lax.rsqrt((var2 + (var1 - var2) * m1) + LN_EPS)

    y = (z - mean) * (inv * gamma) + beta   # gamma folded into the scale
    return jnp.where(y > 0, y, LEAKY_SLOPE * y)


def _critic_kernel(fuse_l2, *refs):
    if fuse_l2:
        (s_ref, a_ref,
         w14_ref, b14_ref, g14_ref, be14_ref,
         w25_ref, b25_ref, g25_ref, be25_ref,
         w36_ref, b36_ref, q_ref) = refs
    else:
        (s_ref, a_ref,
         w14_ref, b14_ref, g14_ref, be14_ref,
         w2_ref, w5_ref, b25_ref, g25_ref, be25_ref,
         w36_ref, b36_ref, q_ref) = refs

    h1 = b14_ref.shape[-1] // 2
    h2 = b25_ref.shape[-1] // 2
    tm = s_ref.shape[0]

    # Per-branch lane masks, hoisted once per tile.  The layer-2 mask is reused
    # by the VPU head, and by layer 1 when h1 == h2.
    col2 = jax.lax.broadcasted_iota(jnp.int32, (tm, 2 * h2), 1)
    m1_l2 = (col2 < h2).astype(jnp.float32)
    if h1 == h2:
        m1_l1 = m1_l2
    else:
        col1 = jax.lax.broadcasted_iota(jnp.int32, (tm, 2 * h1), 1)
        m1_l1 = (col1 < h1).astype(jnp.float32)

    # Layer 1: in-kernel lane concat of [state | action], single fused fc1|fc4
    # matmul (one MXU pass instead of two split-K passes + add).
    x = jnp.concatenate([s_ref[...], a_ref[...]], axis=1).astype(w14_ref.dtype)
    z = jnp.dot(x, w14_ref[...], preferred_element_type=jnp.float32) + b14_ref[...]
    h = _twin_ln_leaky(z, g14_ref[...], be14_ref[...], m1_l1, 1.0 / float(h1))

    # Layer 2: block-diagonal fused fc2|fc5 when it fits one MXU weight tile,
    # otherwise two separate matmuls (avoids pushing structural zeros).
    if fuse_l2:
        z = (jnp.dot(h.astype(w25_ref.dtype), w25_ref[...],
                     preferred_element_type=jnp.float32) + b25_ref[...])
    else:
        ha = h[:, :h1].astype(w2_ref.dtype)
        hb = h[:, h1:].astype(w5_ref.dtype)
        z = jnp.concatenate(
            [jnp.dot(ha, w2_ref[...], preferred_element_type=jnp.float32),
             jnp.dot(hb, w5_ref[...], preferred_element_type=jnp.float32)],
            axis=1) + b25_ref[...]
    h = _twin_ln_leaky(z, g25_ref[...], be25_ref[...], m1_l2, 1.0 / float(h2))

    # Heads fc3/fc6 on the VPU: broadcast-multiply + masked lane sums
    # (an MXU pass for 2 useful output lanes is not worth its push count).
    hw = h * w36_ref[...]                                  # (tm, 2*h2)
    s1 = jnp.sum(hw * m1_l2, axis=-1, keepdims=True)       # q1 pre-bias
    st = jnp.sum(hw, axis=-1, keepdims=True)
    q_ref[...] = jnp.concatenate([s1, st - s1], axis=1) + b36_ref[...]


# ---------------------------------------------------------------------------
# Parameter fusion (done once, outside the kernel)
# ---------------------------------------------------------------------------
def fuse_critic_params(p, *, param_dtype=jnp.bfloat16, mxu_tile=None):
    """Pre-fuse the twin-branch weights.  Matmul operands are cast to
    `param_dtype` (bf16 default); biases / LayerNorm params / head weights stay
    f32 since all post-matmul math is f32.  Layer-2 block-diag fusion is only
    used when both fused dims fit one MXU weight tile."""
    f32 = jnp.float32
    h1 = p["w1"].shape[1]
    h2 = p["w2"].shape[1]
    if mxu_tile is None:
        mxu_tile = _mxu_tile()
    fuse_l2 = (2 * h1 <= mxu_tile) and (2 * h2 <= mxu_tile)

    cat = lambda a, b: jnp.concatenate([a, b])[None, :].astype(f32)

    fused = {
        "w14": jnp.concatenate([p["w1"], p["w4"]], axis=1).astype(param_dtype),
        "b14": cat(p["b1"], p["b4"]),
        "g14": cat(p["g1"], p["g4"]),
        "be14": cat(p["be1"], p["be4"]),
        "b25": cat(p["b2"], p["b5"]),
        "g25": cat(p["g2"], p["g5"]),
        "be25": cat(p["be2"], p["be5"]),
        # Head weights as a (1, 2*h2) f32 row: used on the VPU, not the MXU.
        "w36": jnp.concatenate([p["w3"][:, 0], p["w6"][:, 0]])[None, :].astype(f32),
        "b36": jnp.concatenate([p["b3"], p["b6"]])[None, :].astype(f32),
    }
    if fuse_l2:
        w25 = jnp.zeros((2 * h1, 2 * h2), f32)
        w25 = w25.at[:h1, :h2].set(p["w2"]).at[h1:, h2:].set(p["w5"])
        fused["w25"] = w25.astype(param_dtype)
    else:
        fused["w2"] = p["w2"].astype(param_dtype)
        fused["w5"] = p["w5"].astype(param_dtype)
    return fused


# ---------------------------------------------------------------------------
# Batch tiling: pick tm first, then pad the batch to a multiple of tm.
# ---------------------------------------------------------------------------
def _round_up(x, m):
    return ((x + m - 1) // m) * m


def _batch_tiling(batch, align, n_cores):
    """Returns (tm, padded_b).  Never degenerates to tiny tiles: for awkward
    batches we pad up to the tile size instead of shrinking the tile."""
    max_tile = 2048
    pad_min = _round_up(max(batch, align), align)
    if n_cores <= 1:
        # v5e / v6e: single TC -> one big tile removes per-step overhead.
        if pad_min <= max_tile:
            return pad_min, pad_min
        tm = 1024
        return tm, _round_up(batch, tm)
    # v7x: 2 TCs -> even number of tiles so the "parallel" axis splits evenly.
    if pad_min <= 2 * align:
        return pad_min, pad_min
    if pad_min <= 2 * max_tile:
        tm = _round_up((pad_min + 1) // 2, align)
        return tm, 2 * tm
    tm = 1024
    padded = _round_up(batch, tm)
    if (padded // tm) % 2:
        padded += tm
    return tm, padded


# ---------------------------------------------------------------------------
# Wrapper
# ---------------------------------------------------------------------------
def critic_forward(state, action, fused, *, interpret=False):
    """Twin-Q critic forward. Returns (q1, q2), each of shape (B, 1) float32."""
    f32 = jnp.float32
    B, state_dim = state.shape
    action_dim = action.shape[1]
    fuse_l2 = "w25" in fused
    param_dtype = fused["w14"].dtype

    align = 16 if param_dtype == jnp.bfloat16 else 8
    tm, padded_b = _batch_tiling(B, align, _num_tensorcores())
    if padded_b != B:
        pad = padded_b - B
        state = jnp.pad(state, ((0, pad), (0, 0)))
        action = jnp.pad(action, ((0, pad), (0, 0)))
    # Inputs are cast to the matmul operand dtype (bf16 by default).
    state = state.astype(param_dtype)
    action = action.astype(param_dtype)

    if fuse_l2:
        names = ("w14", "b14", "g14", "be14",
                 "w25", "b25", "g25", "be25", "w36", "b36")
    else:
        names = ("w14", "b14", "g14", "be14",
                 "w2", "w5", "b25", "g25", "be25", "w36", "b36")
    ordered = [fused[k] for k in names]

    grid = (padded_b // tm,)
    in_specs = [
        pl.BlockSpec((tm, state_dim), lambda i: (i, 0)),
        pl.BlockSpec((tm, action_dim), lambda i: (i, 0)),
    ] + [
        # Whole-array, constant index_map -> weights stay VMEM-resident.
        pl.BlockSpec(w.shape, lambda i: (0, 0)) for w in ordered
    ]
    out_specs = pl.BlockSpec((tm, 2), lambda i: (i, 0))

    q = pl.pallas_call(
        functools.partial(_critic_kernel, fuse_l2),
        grid=grid,
        in_specs=in_specs,
        out_specs=out_specs,
        out_shape=jax.ShapeDtypeStruct((padded_b, 2), f32),
        compiler_params=pltpu.CompilerParams(dimension_semantics=("parallel",)),
        interpret=interpret,
    )(state, action, *ordered)

    return q[:B, 0:1], q[:B, 1:2]


# ---------------------------------------------------------------------------
# Parameter init (matches the PyTorch module's init_weights)
# ---------------------------------------------------------------------------
def _kaiming_uniform_leaky(key, fan_in, fan_out, a=LEAKY_SLOPE):
    gain = jnp.sqrt(2.0 / (1.0 + a * a))
    bound = gain * jnp.sqrt(3.0 / fan_in)
    return jax.random.uniform(
        key, (fan_in, fan_out), dtype=jnp.float32, minval=-bound, maxval=bound
    )


def init_critic_params(key, state_dim, action_dim, h1, h2):
    d_in = state_dim + action_dim
    keys = jax.random.split(key, 6)
    p = {}
    # Branch 1
    p["w1"] = _kaiming_uniform_leaky(keys[0], d_in, h1)
    p["b1"] = jnp.zeros((h1,), jnp.float32)
    p["g1"] = jnp.ones((h1,), jnp.float32)
    p["be1"] = jnp.zeros((h1,), jnp.float32)
    p["w2"] = _kaiming_uniform_leaky(keys[1], h1, h2)
    p["b2"] = jnp.zeros((h2,), jnp.float32)
    p["g2"] = jnp.ones((h2,), jnp.float32)
    p["be2"] = jnp.zeros((h2,), jnp.float32)
    p["w3"] = _kaiming_uniform_leaky(keys[2], h2, 1)
    p["b3"] = jnp.zeros((1,), jnp.float32)
    # Branch 2
    p["w4"] = _kaiming_uniform_leaky(keys[3], d_in, h1)
    p["b4"] = jnp.zeros((h1,), jnp.float32)
    p["g4"] = jnp.ones((h1,), jnp.float32)
    p["be4"] = jnp.zeros((h1,), jnp.float32)
    p["w5"] = _kaiming_uniform_leaky(keys[4], h1, h2)
    p["b5"] = jnp.zeros((h2,), jnp.float32)
    p["g5"] = jnp.ones((h2,), jnp.float32)
    p["be5"] = jnp.zeros((h2,), jnp.float32)
    p["w6"] = _kaiming_uniform_leaky(keys[5], h2, 1)
    p["b6"] = jnp.zeros((1,), jnp.float32)
    return p


# ---------------------------------------------------------------------------
# Pure-JAX reference (unfused, mirrors the PyTorch module)
# ---------------------------------------------------------------------------
def _reference_forward(state, action, p):
    def leaky(x):
        return jnp.where(x > 0, x, LEAKY_SLOPE * x)

    def layer_norm(x, gamma, beta):
        mean = jnp.mean(x, axis=-1, keepdims=True)
        var = jnp.mean(jnp.square(x - mean), axis=-1, keepdims=True)
        return (x - mean) * jax.lax.rsqrt(var + LN_EPS) * gamma + beta

    x = jnp.concatenate([state, action], axis=1)

    def branch(w_a, b_a, g_a, be_a, w_b, b_b, g_b, be_b, w_c, b_c):
        h = x @ w_a + b_a
        h = leaky(layer_norm(h, g_a, be_a))
        h = h @ w_b + b_b
        h = leaky(layer_norm(h, g_b, be_b))
        return h @ w_c + b_c

    q1 = branch(p["w1"], p["b1"], p["g1"], p["be1"],
                p["w2"], p["b2"], p["g2"], p["be2"], p["w3"], p["b3"])
    q2 = branch(p["w4"], p["b4"], p["g4"], p["be4"],
                p["w5"], p["b5"], p["g5"], p["be5"], p["w6"], p["b6"])
    return q1, q2


# ---------------------------------------------------------------------------
# Demo / correctness checks
# ---------------------------------------------------------------------------
if __name__ == "__main__":
    key = jax.random.PRNGKey(0)
    k_state, k_action, k_params, k_state2, k_action2, k_params2 = \
        jax.random.split(key, 6)

    batch = 8
    state_dim = 16
    action_dim = 4
    hidden_dim_1 = 32
    hidden_dim_2 = 32

    state = jax.random.normal(k_state, (batch, state_dim), dtype=jnp.float32)
    action = jax.random.normal(k_action, (batch, action_dim), dtype=jnp.float32)
    params = init_critic_params(k_params, state_dim, action_dim,
                                hidden_dim_1, hidden_dim_2)
    r1, r2 = _reference_forward(state, action, params)

    # --- f32 path (exact-precision check, fused block-diag layer 2) --------
    fused_f32 = fuse_critic_params(params, param_dtype=jnp.float32)
    q1, q2 = critic_forward(state, action, fused_f32)
    q1 = jax.block_until_ready(q1)
    q2 = jax.block_until_ready(q2)
    assert q1.shape == (batch, 1) and q2.shape == (batch, 1)
    assert jnp.allclose(q1, r1, atol=1e-4, rtol=1e-4)
    assert jnp.allclose(q2, r2, atol=1e-4, rtol=1e-4)

    # --- larger, awkward batch: exercises pad-to-tile path ------------------
    batch2 = 250
    state_b = jax.random.normal(k_state2, (batch2, state_dim), dtype=jnp.float32)
    action_b = jax.random.normal(k_action2, (batch2, action_dim), dtype=jnp.float32)
    q1b, q2b = critic_forward(state_b, action_b, fused_f32)
    q1b = jax.block_until_ready(q1b)
    q2b = jax.block_until_ready(q2b)
    r1b, r2b = _reference_forward(state_b, action_b, params)
    assert q1b.shape == (batch2, 1) and q2b.shape == (batch2, 1)
    assert jnp.allclose(q1b, r1b, atol=1e-4, rtol=1e-4)
    assert jnp.allclose(q2b, r2b, atol=1e-4, rtol=1e-4)

    # --- bf16 default path (bf16 matmul operands, f32 accumulation/LN) -----
    fused_bf16 = fuse_critic_params(params)           # param_dtype defaults to bf16
    q1c, q2c = critic_forward(state, action, fused_bf16)
    q1c = jax.block_until_ready(q1c)
    q2c = jax.block_until_ready(q2c)
    assert bool(jnp.all(jnp.isfinite(q1c))) and bool(jnp.all(jnp.isfinite(q2c)))
    assert jnp.allclose(q1c, r1, atol=1e-1, rtol=1e-1)
    assert jnp.allclose(q2c, r2, atol=1e-1, rtol=1e-1)

    # --- large hidden width: exercises the un-fused layer-2 path -----------
    hid = 256                                          # 2*hid > MXU tile everywhere
    batch3 = 64
    params_big = init_critic_params(k_params2, state_dim, action_dim, hid, hid)
    fused_big = fuse_critic_params(params_big, param_dtype=jnp.float32)
    assert "w25" not in fused_big                      # layer-2 fusion gated off
    q1d, q2d = critic_forward(state, action, fused_big)
    q1d = jax.block_until_ready(q1d)
    q2d = jax.block_until_ready(q2d)
    r1d, r2d = _reference_forward(state, action, params_big)
    assert jnp.allclose(q1d, r1d, atol=1e-3, rtol=1e-3)
    assert jnp.allclose(q2d, r2d, atol=1e-3, rtol=1e-3)

    print("KERNEL_OK")
</pallas_src>

<mosaic_0001>
module attributes {stable_mosaic.version = 11 : i64} {
  func.func @_critic_kernel(%arg0: i32, %arg1: memref<8x16xf32, #tpu.memory_space<vmem>>, %arg2: memref<8x4xf32, #tpu.memory_space<vmem>>, %arg3: memref<20x64xf32, #tpu.memory_space<vmem>>, %arg4: memref<1x64xf32, #tpu.memory_space<vmem>>, %arg5: memref<1x64xf32, #tpu.memory_space<vmem>>, %arg6: memref<1x64xf32, #tpu.memory_space<vmem>>, %arg7: memref<64x64xf32, #tpu.memory_space<vmem>>, %arg8: memref<1x64xf32, #tpu.memory_space<vmem>>, %arg9: memref<1x64xf32, #tpu.memory_space<vmem>>, %arg10: memref<1x64xf32, #tpu.memory_space<vmem>>, %arg11: memref<1x64xf32, #tpu.memory_space<vmem>>, %arg12: memref<1x2xf32, #tpu.memory_space<vmem>>, %arg13: memref<8x2xf32, #tpu.memory_space<vmem>>) attributes {dimension_semantics = [#tpu.dimension_semantics<parallel>], iteration_bounds = array<i64: 1>, scalar_prefetch = 0 : i64, scratch_operands = 0 : i64, tpu.core_type = #tpu.core_type<tc>, window_params = [{transform_indices = @transform_0, window_bounds = array<i64: 8, 16>}, {transform_indices = @transform_1, window_bounds = array<i64: 8, 4>}, {pipeline_mode = #tpu.pipeline_mode<synchronous>, transform_indices = @transform_2, window_bounds = array<i64: 20, 64>}, {pipeline_mode = #tpu.pipeline_mode<synchronous>, transform_indices = @transform_3, window_bounds = array<i64: 1, 64>}, {pipeline_mode = #tpu.pipeline_mode<synchronous>, transform_indices = @transform_4, window_bounds = array<i64: 1, 64>}, {pipeline_mode = #tpu.pipeline_mode<synchronous>, transform_indices = @transform_5, window_bounds = array<i64: 1, 64>}, {pipeline_mode = #tpu.pipeline_mode<synchronous>, transform_indices = @transform_6, window_bounds = array<i64: 64, 64>}, {pipeline_mode = #tpu.pipeline_mode<synchronous>, transform_indices = @transform_7, window_bounds = array<i64: 1, 64>}, {pipeline_mode = #tpu.pipeline_mode<synchronous>, transform_indices = @transform_8, window_bounds = array<i64: 1, 64>}, {pipeline_mode = #tpu.pipeline_mode<synchronous>, transform_indices = @transform_9, window_bounds = array<i64: 1, 64>}, {pipeline_mode = #tpu.pipeline_mode<synchronous>, transform_indices = @transform_10, window_bounds = array<i64: 1, 64>}, {pipeline_mode = #tpu.pipeline_mode<synchronous>, transform_indices = @transform_11, window_bounds = array<i64: 1, 2>}, {transform_indices = @transform_12, window_bounds = array<i64: 8, 2>}]} {
    %0 = tpu.iota {dimensions = array<i32: 1>} : vector<8x64xi32>
    %c32_i32 = arith.constant 32 : i32
    %1 = vector.broadcast %c32_i32 : i32 to vector<8x64xi32>
    %2 = arith.cmpi slt, %0, %1 : vector<8x64xi32>
    %3 = arith.extui %2 : vector<8x64xi1> to vector<8x64xi32>
    %4 = arith.sitofp %3 : vector<8x64xi32> to vector<8x64xf32>
    %c0 = arith.constant 0 : index
    %c0_0 = arith.constant 0 : index
    %5 = vector.load %arg1[%c0, %c0_0] : memref<8x16xf32, #tpu.memory_space<vmem>>, vector<8x16xf32>
    %c0_1 = arith.constant 0 : index
    %c0_2 = arith.constant 0 : index
    %6 = vector.load %arg2[%c0_1, %c0_2] : memref<8x4xf32, #tpu.memory_space<vmem>>, vector<8x4xf32>
    %7 = tpu.concatenate %5, %6 in 1 : vector<8x16xf32>, vector<8x4xf32> -> vector<8x20xf32>
    %c0_3 = arith.constant 0 : index
    %c0_4 = arith.constant 0 : index
    %8 = vector.load %arg3[%c0_3, %c0_4] : memref<20x64xf32, #tpu.memory_space<vmem>>, vector<20x64xf32>
    %cst = arith.constant dense<0.000000e+00> : vector<8x64xf32>
    %9 = tpu.matmul %7, %8, %cst {dimension_numbers = #tpu.dot_dimension_numbers<[1], [0], [0], [1], [0, 0, 1, 1], [], []>} : vector<8x20xf32>, vector<20x64xf32>, vector<8x64xf32> -> vector<8x64xf32>
    %c0_5 = arith.constant 0 : index
    %c0_6 = arith.constant 0 : index
    %10 = vector.load %arg4[%c0_5, %c0_6] : memref<1x64xf32, #tpu.memory_space<vmem>>, vector<1x64xf32>
    %11 = vector.broadcast %10 : vector<1x64xf32> to vector<8x64xf32>
    %12 = arith.addf %9, %11 : vector<8x64xf32>
    %c0_7 = arith.constant 0 : index
    %c0_8 = arith.constant 0 : index
    %13 = vector.load %arg5[%c0_7, %c0_8] : memref<1x64xf32, #tpu.memory_space<vmem>>, vector<1x64xf32>
    %c0_9 = arith.constant 0 : index
    %c0_10 = arith.constant 0 : index
    %14 = vector.load %arg6[%c0_9, %c0_10] : memref<1x64xf32, #tpu.memory_space<vmem>>, vector<1x64xf32>
    %15 = arith.mulf %12, %4 : vector<8x64xf32>
    %cst_11 = arith.constant dense<0.000000e+00> : vector<8xf32>
    %16 = vector.multi_reduction <add>, %15, %cst_11 [1] : vector<8x64xf32> to vector<8xf32>
    %17 = vector.shape_cast %16 : vector<8xf32> to vector<8x1xf32>
    %cst_12 = arith.constant dense<0.000000e+00> : vector<8xf32>
    %18 = vector.multi_reduction <add>, %12, %cst_12 [1] : vector<8x64xf32> to vector<8xf32>
    %19 = vector.shape_cast %18 : vector<8xf32> to vector<8x1xf32>
    %20 = arith.mulf %12, %12 : vector<8x64xf32>
    %21 = arith.mulf %20, %4 : vector<8x64xf32>
    %cst_13 = arith.constant dense<0.000000e+00> : vector<8xf32>
    %22 = vector.multi_reduction <add>, %21, %cst_13 [1] : vector<8x64xf32> to vector<8xf32>
    %23 = vector.shape_cast %22 : vector<8xf32> to vector<8x1xf32>
    %cst_14 = arith.constant dense<0.000000e+00> : vector<8xf32>
    %24 = vector.multi_reduction <add>, %20, %cst_14 [1] : vector<8x64xf32> to vector<8xf32>
    %25 = vector.shape_cast %24 : vector<8xf32> to vector<8x1xf32>
    %cst_15 = arith.constant 3.125000e-02 : f32
    %26 = vector.broadcast %cst_15 : f32 to vector<8x1xf32>
    %27 = arith.mulf %17, %26 : vector<8x1xf32>
    %28 = arith.subf %19, %17 : vector<8x1xf32>
    %cst_16 = arith.constant 3.125000e-02 : f32
    %29 = vector.broadcast %cst_16 : f32 to vector<8x1xf32>
    %30 = arith.mulf %28, %29 : vector<8x1xf32>
    %cst_17 = arith.constant 3.125000e-02 : f32
    %31 = vector.broadcast %cst_17 : f32 to vector<8x1xf32>
    %32 = arith.mulf %23, %31 : vector<8x1xf32>
    %33 = arith.subf %25, %23 : vector<8x1xf32>
    %cst_18 = arith.constant 3.125000e-02 : f32
    %34 = vector.broadcast %cst_18 : f32 to vector<8x1xf32>
    %35 = arith.mulf %33, %34 : vector<8x1xf32>
    %36 = arith.mulf %27, %27 : vector<8x1xf32>
    %37 = arith.subf %32, %36 : vector<8x1xf32>
    %cst_19 = arith.constant 0.000000e+00 : f32
    %38 = vector.broadcast %cst_19 : f32 to vector<8x1xf32>
    %39 = arith.maximumf %37, %38 : vector<8x1xf32>
    %40 = arith.mulf %30, %30 : vector<8x1xf32>
    %41 = arith.subf %35, %40 : vector<8x1xf32>
    %cst_20 = arith.constant 0.000000e+00 : f32
    %42 = vector.broadcast %cst_20 : f32 to vector<8x1xf32>
    %43 = arith.maximumf %41, %42 : vector<8x1xf32>
    %44 = arith.subf %27, %30 : vector<8x1xf32>
    %45 = vector.broadcast %44 : vector<8x1xf32> to vector<8x64xf32>
    %46 = arith.mulf %45, %4 : vector<8x64xf32>
    %47 = vector.broadcast %30 : vector<8x1xf32> to vector<8x64xf32>
    %48 = arith.addf %47, %46 : vector<8x64xf32>
    %49 = arith.subf %39, %43 : vector<8x1xf32>
    %50 = vector.broadcast %49 : vector<8x1xf32> to vector<8x64xf32>
    %51 = arith.mulf %50, %4 : vector<8x64xf32>
    %52 = vector.broadcast %43 : vector<8x1xf32> to vector<8x64xf32>
    %53 = arith.addf %52, %51 : vector<8x64xf32>
    %cst_21 = arith.constant 9.99999974E-6 : f32
    %54 = vector.broadcast %cst_21 : f32 to vector<8x64xf32>
    %55 = arith.addf %53, %54 : vector<8x64xf32>
    %56 = math.rsqrt %55 : vector<8x64xf32>
    %57 = arith.subf %12, %48 : vector<8x64xf32>
    %58 = vector.broadcast %13 : vector<1x64xf32> to vector<8x64xf32>
    %59 = arith.mulf %56, %58 : vector<8x64xf32>
    %60 = arith.mulf %57, %59 : vector<8x64xf32>
    %61 = vector.broadcast %14 : vector<1x64xf32> to vector<8x64xf32>
    %62 = arith.addf %60, %61 : vector<8x64xf32>
    %cst_22 = arith.constant 0.000000e+00 : f32
    %63 = vector.broadcast %cst_22 : f32 to vector<8x64xf32>
    %64 = arith.cmpf ogt, %62, %63 : vector<8x64xf32>
    %cst_23 = arith.constant 0.00999999977 : f32
    %65 = vector.broadcast %cst_23 : f32 to vector<8x64xf32>
    %66 = arith.mulf %65, %62 : vector<8x64xf32>
    %67 = arith.select %64, %62, %66 : vector<8x64xi1>, vector<8x64xf32>
    %c0_24 = arith.constant 0 : index
    %c0_25 = arith.constant 0 : index
    %68 = vector.load %arg7[%c0_24, %c0_25] : memref<64x64xf32, #tpu.memory_space<vmem>>, vector<64x64xf32>
    %cst_26 = arith.constant dense<0.000000e+00> : vector<8x64xf32>
    %69 = tpu.matmul %67, %68, %cst_26 {dimension_numbers = #tpu.dot_dimension_numbers<[1], [0], [0], [1], [0, 0, 1, 1], [], []>} : vector<8x64xf32>, vector<64x64xf32>, vector<8x64xf32> -> vector<8x64xf32>
    %c0_27 = arith.constant 0 : index
    %c0_28 = arith.constant 0 : index
    %70 = vector.load %arg8[%c0_27, %c0_28] : memref<1x64xf32, #tpu.memory_space<vmem>>, vector<1x64xf32>
    %71 = vector.broadcast %70 : vector<1x64xf32> to vector<8x64xf32>
    %72 = arith.addf %69, %71 : vector<8x64xf32>
    %c0_29 = arith.constant 0 : index
    %c0_30 = arith.constant 0 : index
    %73 = vector.load %arg9[%c0_29, %c0_30] : memref<1x64xf32, #tpu.memory_space<vmem>>, vector<1x64xf32>
    %c0_31 = arith.constant 0 : index
    %c0_32 = arith.constant 0 : index
    %74 = vector.load %arg10[%c0_31, %c0_32] : memref<1x64xf32, #tpu.memory_space<vmem>>, vector<1x64xf32>
    %75 = arith.mulf %72, %4 : vector<8x64xf32>
    %cst_33 = arith.constant dense<0.000000e+00> : vector<8xf32>
    %76 = vector.multi_reduction <add>, %75, %cst_33 [1] : vector<8x64xf32> to vector<8xf32>
    %77 = vector.shape_cast %76 : vector<8xf32> to vector<8x1xf32>
    %cst_34 = arith.constant dense<0.000000e+00> : vector<8xf32>
    %78 = vector.multi_reduction <add>, %72, %cst_34 [1] : vector<8x64xf32> to vector<8xf32>
    %79 = vector.shape_cast %78 : vector<8xf32> to vector<8x1xf32>
    %80 = arith.mulf %72, %72 : vector<8x64xf32>
    %81 = arith.mulf %80, %4 : vector<8x64xf32>
    %cst_35 = arith.constant dense<0.000000e+00> : vector<8xf32>
    %82 = vector.multi_reduction <add>, %81, %cst_35 [1] : vector<8x64xf32> to vector<8xf32>
    %83 = vector.shape_cast %82 : vector<8xf32> to vector<8x1xf32>
    %cst_36 = arith.constant dense<0.000000e+00> : vector<8xf32>
    %84 = vector.multi_reduction <add>, %80, %cst_36 [1] : vector<8x64xf32> to vector<8xf32>
    %85 = vector.shape_cast %84 : vector<8xf32> to vector<8x1xf32>
    %cst_37 = arith.constant 3.125000e-02 : f32
    %86 = vector.broadcast %cst_37 : f32 to vector<8x1xf32>
    %87 = arith.mulf %77, %86 : vector<8x1xf32>
    %88 = arith.subf %79, %77 : vector<8x1xf32>
    %cst_38 = arith.constant 3.125000e-02 : f32
    %89 = vector.broadcast %cst_38 : f32 to vector<8x1xf32>
    %90 = arith.mulf %88, %89 : vector<8x1xf32>
    %cst_39 = arith.constant 3.125000e-02 : f32
    %91 = vector.broadcast %cst_39 : f32 to vector<8x1xf32>
    %92 = arith.mulf %83, %91 : vector<8x1xf32>
    %93 = arith.subf %85, %83 : vector<8x1xf32>
    %cst_40 = arith.constant 3.125000e-02 : f32
    %94 = vector.broadcast %cst_40 : f32 to vector<8x1xf32>
    %95 = arith.mulf %93, %94 : vector<8x1xf32>
    %96 = arith.mulf %87, %87 : vector<8x1xf32>
    %97 = arith.subf %92, %96 : vector<8x1xf32>
    %cst_41 = arith.constant 0.000000e+00 : f32
    %98 = vector.broadcast %cst_41 : f32 to vector<8x1xf32>
    %99 = arith.maximumf %97, %98 : vector<8x1xf32>
    %100 = arith.mulf %90, %90 : vector<8x1xf32>
    %101 = arith.subf %95, %100 : vector<8x1xf32>
    %cst_42 = arith.constant 0.000000e+00 : f32
    %102 = vector.broadcast %cst_42 : f32 to vector<8x1xf32>
    %103 = arith.maximumf %101, %102 : vector<8x1xf32>
    %104 = arith.subf %87, %90 : vector<8x1xf32>
    %105 = vector.broadcast %104 : vector<8x1xf32> to vector<8x64xf32>
    %106 = arith.mulf %105, %4 : vector<8x64xf32>
    %107 = vector.broadcast %90 : vector<8x1xf32> to vector<8x64xf32>
    %108 = arith.addf %107, %106 : vector<8x64xf32>
    %109 = arith.subf %99, %103 : vector<8x1xf32>
    %110 = vector.broadcast %109 : vector<8x1xf32> to vector<8x64xf32>
    %111 = arith.mulf %110, %4 : vector<8x64xf32>
    %112 = vector.broadcast %103 : vector<8x1xf32> to vector<8x64xf32>
    %113 = arith.addf %112, %111 : vector<8x64xf32>
    %cst_43 = arith.constant 9.99999974E-6 : f32
    %114 = vector.broadcast %cst_43 : f32 to vector<8x64xf32>
    %115 = arith.addf %113, %114 : vector<8x64xf32>
    %116 = math.rsqrt %115 : vector<8x64xf32>
    %117 = arith.subf %72, %108 : vector<8x64xf32>
    %118 = vector.broadcast %73 : vector<1x64xf32> to vector<8x64xf32>
    %119 = arith.mulf %116, %118 : vector<8x64xf32>
    %120 = arith.mulf %117, %119 : vector<8x64xf32>
    %121 = vector.broadcast %74 : vector<1x64xf32> to vector<8x64xf32>
    %122 = arith.addf %120, %121 : vector<8x64xf32>
    %cst_44 = arith.constant 0.000000e+00 : f32
    %123 = vector.broadcast %cst_44 : f32 to vector<8x64xf32>
    %124 = arith.cmpf ogt, %122, %123 : vector<8x64xf32>
    %cst_45 = arith.constant 0.00999999977 : f32
    %125 = vector.broadcast %cst_45 : f32 to vector<8x64xf32>
    %126 = arith.mulf %125, %122 : vector<8x64xf32>
    %127 = arith.select %124, %122, %126 : vector<8x64xi1>, vector<8x64xf32>
    %c0_46 = arith.constant 0 : index
    %c0_47 = arith.constant 0 : index
    %128 = vector.load %arg11[%c0_46, %c0_47] : memref<1x64xf32, #tpu.memory_space<vmem>>, vector<1x64xf32>
    %129 = vector.broadcast %128 : vector<1x64xf32> to vector<8x64xf32>
    %130 = arith.mulf %127, %129 : vector<8x64xf32>
    %131 = arith.mulf %130, %4 : vector<8x64xf32>
    %cst_48 = arith.constant dense<0.000000e+00> : vector<8xf32>
    %132 = vector.multi_reduction <add>, %131, %cst_48 [1] : vector<8x64xf32> to vector<8xf32>
    %133 = vector.shape_cast %132 : vector<8xf32> to vector<8x1xf32>
    %cst_49 = arith.constant dense<0.000000e+00> : vector<8xf32>
    %134 = vector.multi_reduction <add>, %130, %cst_49 [1] : vector<8x64xf32> to vector<8xf32>
    %135 = vector.shape_cast %134 : vector<8xf32> to vector<8x1xf32>
    %136 = arith.subf %135, %133 : vector<8x1xf32>
    %137 = tpu.concatenate %133, %136 in 1 : vector<8x1xf32>, vector<8x1xf32> -> vector<8x2xf32>
    %c0_50 = arith.constant 0 : index
    %c0_51 = arith.constant 0 : index
    %138 = vector.load %arg12[%c0_50, %c0_51] : memref<1x2xf32, #tpu.memory_space<vmem>>, vector<1x2xf32>
    %139 = vector.broadcast %138 : vector<1x2xf32> to vector<8x2xf32>
    %140 = arith.addf %137, %139 : vector<8x2xf32>
    %c0_52 = arith.constant 0 : index
    %c0_53 = arith.constant 0 : index
    %141 = vector.load %arg13[%c0_52, %c0_53] : memref<8x2xf32, #tpu.memory_space<vmem>>, vector<8x2xf32>
    tpu.vector_store %arg13[%c0_52, %c0_53], %140 {strides = array<i32>} : memref<8x2xf32, #tpu.memory_space<vmem>>, vector<8x2xf32>,
    return
  }
  func.func @transform_0(%arg0: i32) -> (i32, i32) {
    %c0_i32 = arith.constant 0 : i32
    %c0_i32_0 = arith.constant 0 : i32
    return %arg0, %c0_i32 : i32, i32
  }
  func.func @transform_1(%arg0: i32) -> (i32, i32) {
    %c0_i32 = arith.constant 0 : i32
    %c0_i32_0 = arith.constant 0 : i32
    return %arg0, %c0_i32 : i32, i32
  }
  func.func @transform_2(%arg0: i32) -> (i32, i32) {
    %c0_i32 = arith.constant 0 : i32
    %c0_i32_0 = arith.constant 0 : i32
    %c0_i32_1 = arith.constant 0 : i32
    return %c0_i32, %c0_i32_0 : i32, i32
  }
  func.func @transform_3(%arg0: i32) -> (i32, i32) {
    %c0_i32 = arith.constant 0 : i32
    %c0_i32_0 = arith.constant 0 : i32
    %c0_i32_1 = arith.constant 0 : i32
    return %c0_i32, %c0_i32_0 : i32, i32
  }
  func.func @transform_4(%arg0: i32) -> (i32, i32) {
    %c0_i32 = arith.constant 0 : i32
    %c0_i32_0 = arith.constant 0 : i32
    %c0_i32_1 = arith.constant 0 : i32
    return %c0_i32, %c0_i32_0 : i32, i32
  }
  func.func @transform_5(%arg0: i32) -> (i32, i32) {
    %c0_i32 = arith.constant 0 : i32
    %c0_i32_0 = arith.constant 0 : i32
    %c0_i32_1 = arith.constant 0 : i32
    return %c0_i32, %c0_i32_0 : i32, i32
  }
  func.func @transform_6(%arg0: i32) -> (i32, i32) {
    %c0_i32 = arith.constant 0 : i32
    %c0_i32_0 = arith.constant 0 : i32
    %c0_i32_1 = arith.constant 0 : i32
    return %c0_i32, %c0_i32_0 : i32, i32
  }
  func.func @transform_7(%arg0: i32) -> (i32, i32) {
    %c0_i32 = arith.constant 0 : i32
    %c0_i32_0 = arith.constant 0 : i32
    %c0_i32_1 = arith.constant 0 : i32
    return %c0_i32, %c0_i32_0 : i32, i32
  }
  func.func @transform_8(%arg0: i32) -> (i32, i32) {
    %c0_i32 = arith.constant 0 : i32
    %c0_i32_0 = arith.constant 0 : i32
    %c0_i32_1 = arith.constant 0 : i32
    return %c0_i32, %c0_i32_0 : i32, i32
  }
  func.func @transform_9(%arg0: i32) -> (i32, i32) {
    %c0_i32 = arith.constant 0 : i32
    %c0_i32_0 = arith.constant 0 : i32
    %c0_i32_1 = arith.constant 0 : i32
    return %c0_i32, %c0_i32_0 : i32, i32
  }
  func.func @transform_10(%arg0: i32) -> (i32, i32) {
    %c0_i32 = arith.constant 0 : i32
    %c0_i32_0 = arith.constant 0 : i32
    %c0_i32_1 = arith.constant 0 : i32
    return %c0_i32, %c0_i32_0 : i32, i32
  }
  func.func @transform_11(%arg0: i32) -> (i32, i32) {
    %c0_i32 = arith.constant 0 : i32
    %c0_i32_0 = arith.constant 0 : i32
    %c0_i32_1 = arith.constant 0 : i32
    return %c0_i32, %c0_i32_0 : i32, i32
  }
  func.func @transform_12(%arg0: i32) -> (i32, i32) {
    %c0_i32 = arith.constant 0 : i32
    %c0_i32_0 = arith.constant 0 : i32
    return %arg0, %c0_i32 : i32, i32
  }
}

</mosaic_0001>

<bundles_post_ra>
// kernel: tpu_custom_call.1
= control target key start
LH: loop header
LB: loop body
LE: loop exit
PB: predicated region body
PF: predicated region fallthrough
CT: control target
= control target key end

     0   :  { %17 = vsyncpa [#allocation3], 0  ;;  %s667_s0 = inlined_call_operand.vmem [shape: f32[8,16], index: 0, kind: input, shape index: {}]   ;;  %s668_s1 = inlined_call_operand.vmem [shape: f32[8,4], index: 1, kind: input, shape index: {}]   ;;  %s669_s2 = inlined_call_operand.hbm [shape: f32[20,64], index: 2, kind: input, shape index: {}]   ;;  %s670_s3 = inlined_call_operand.vmem [shape: f32[1,64], index: 3, kind: input, shape index: {}]   ;;  %s671_s4 = inlined_call_operand.vmem [shape: f32[1,64], index: 4, kind: input, shape index: {}]   ;;  %s672_s5 = inlined_call_operand.vmem [shape: f32[1,64], index: 5, kind: input, shape index: {}]   ;;  %s673_s6 = inlined_call_operand.hbm [shape: f32[64,64], index: 6, kind: input, shape index: {}]   ;;  %s674_s7 = inlined_call_operand.vmem [shape: f32[1,64], index: 7, kind: input, shape index: {}]   ;;  %s675_s8 = inlined_call_operand.vmem [shape: f32[1,64], index: 8, kind: input, shape index: {}]   ;;  %s676_s9 = inlined_call_operand.vmem [shape: f32[1,64], index: 9, kind: input, shape index: {}]   ;;  %s677_s10 = inlined_call_operand.vmem [shape: f32[1,64], index: 10, kind: input, shape index: {}]   ;;  %s678_s11 = inlined_call_operand.vmem [shape: f32[1,2], index: 11, kind: input, shape index: {}]   ;;  %s679_s12 = inlined_call_operand.vmem [shape: f32[8,2], index: 12, kind: output, shape index: {}]  }
   0x1   :  { %18 = vsyncpa [#allocation5], 0  ;;  %s513_s21 = smov [#allocation2]  }
   0x2   :  { %s28_s22 = sshll.u32 %s513_s21, 4  ;;  %s29_s22 = int_to_ptr.vmem [resolvable:$true] %s28_s22 }
   0x3   :  { %s477_s23 = scalar_lea.vmem %s29_s22, 384  ;;  %p482_p1 = scmp.lt.s32.totalorder %s29_s22, %s29_s22 }
   0x4   :  { %p478_p0 = scmp.ne.s32.totalorder %s29_s22, %s477_s23  ;;  %p483_p2 = scmp.lt.s32.totalorder %s477_s23, %s477_s23 }
   0x6   :  { %p484_p3 = por %p483_p2, %p482_p1 }
   0x8   :  { %p485_p4 = pnand %p484_p3, %p478_p0 }
   0xa   :  { %488 = shalt.err (!%p485_p4)
}
   0xb   :  { %s514_s24 = smov 128   ;;  %s515_s25 = smov 8  }
   0xc   :  { %34 = dma.hbm_to_vmem [thread:$0]  %s669_s2, 384, %s29_s22, [#allocation3], %s514_s24, %s514_s24, %s515_s25  }
   0xd   :  { %s516_s28 = smov [#allocation4]  }
   0xe   :  { %s46_s29 = sshll.u32 %s516_s28, 4  ;;  %s47_s29 = int_to_ptr.vmem [resolvable:$true] %s46_s29 }
   0xf   :  { %s497_s30 = scalar_lea.vmem %s47_s29, 1024  ;;  %p502_p6 = scmp.lt.s32.totalorder %s47_s29, %s47_s29 }
  0x10   :  { %p498_p5 = scmp.ne.s32.totalorder %s47_s29, %s497_s30  ;;  %p503_p7 = scmp.lt.s32.totalorder %s497_s30, %s497_s30 }
  0x12   :  { %p504_p8 = por %p503_p7, %p502_p6 }
  0x14   :  { %p505_p9 = pnand %p504_p8, %p498_p5 }
  0x16   :  { %508 = shalt.err (!%p505_p9)
}
  0x17   :  { %52 = dma.hbm_to_vmem [thread:$0]  %s673_s6, 1024, %s47_s29, [#allocation5], %s514_s24, %s514_s24, %s515_s25  }
  0x18   :  { %509 = dma.done.wait [#allocation3], 384  }
  0x19   :  { %510 = vsyncadd [#allocation3], 4294966912 }
  0x1a   :  { %511 = dma.done.wait [#allocation5], 1024  }
  0x1b   :  { %512 = vsyncadd [#allocation5], 4294966272  ;;  %v517_v0 = vmov 0.0   ;;  %vm518_vm0 = vmmov 0   ;;  %vm96_vm1 = vcmask 1043456   ;;  %v75_v1 = vld [vmem:[%s668_s1] sm:$0xff]  ;;  %v69_v8 = vlaneseq }
  0x1c   :  { %430 = vmatprep.subr.mxu0 %v517_v0  ;;  %439 = vmatprep.subr.mxu1 %v517_v0  ;;  %v84_v2 = vld [vmem:[#allocation2 + $0x10] sm:$0xf]  ;;  %v83_v3 = vld [vmem:[#allocation2 + $0x8] sm:$0xff]  ;;  %s519_s6 = smov 16   ;;  %v82_v4 = vld [vmem:[#allocation2] sm:$0xff]  ;;  %vm80_vm2 = vcmask 130048  }
  0x1d   :  { %436 = vmatprep.mubr.msk.f32.mxu0 %vm518_vm0, %v517_v0  ;;  %455 = vmatprep.mubr.msk.f32.mxu1 %vm518_vm0, %v517_v0  ;;  %v74_v5 = vld [vmem:[%s667_s0] sm:$0xff]  ;;  %vm92_vm3 = vcmask 162816   ;;  %v70_v9 = vand.u32 127, %v69_v8  ;;  %vm173_vm5 = vcmask 523264   ;;  %v234_v22 = vld [vmem:[#allocation4 + $0x38] sm:$0xff]  ;;  %v233_v23 = vld [vmem:[#allocation4 + $0x30] sm:$0xff] }
  0x1e   :  { %77 = vrot.lane.b32.xlu0 %v75_v1, %s519_s6  ;;  %431 = vmatpush3.msk.msra.mxu0 %vm96_vm1, %v84_v2  ;;  %v406_v10 = vld [vmem:[%s670_s3] ss:$0 sm:$0xff]  ;;  %v231_v25 = vld [vmem:[#allocation4 + $0x20] sm:$0xff]  ;;  %v230_v26 = vld [vmem:[#allocation4 + $0x18] sm:$0xff]  ;;  %vm387_vm8 = vcmask 7168   ;;  %vm397_vm9 = vcmask 15360  }
  0x1f   :  { %432 = vmatprep.subr.mxu0 %v517_v0  ;;  %vm71_vm4 = vcmp.lt.s32.totalorder %v70_v9, 32  ;;  %440 = vmatpush3.msra.mxu1 %v234_v22  ;;  %v232_v24 = vld [vmem:[#allocation4 + $0x28] sm:$0xff]  ;;  %v229_v27 = vld [vmem:[#allocation4 + $0x10] sm:$0xff]  ;;  %v227_v29 = vld [vmem:[#allocation4] sm:$0xff] }
  0x20   :  { %433 = vmatpush3.msra.mxu0 %v83_v3  ;;  %v607_v12 = vsel %vm71_vm4, 1.0, %v517_v0  ;;  %441 = vmatprep.subr.mxu1 %v517_v0  ;;  %v228_v28 = vld [vmem:[#allocation4 + $0x8] sm:$0xff] }
  0x21   :  { %434 = vmatprep.subr.mxu0 %v517_v0  ;;  %442 = vmatpush3.msra.mxu1 %v233_v23  ;;  %v409_v53 = vld [vmem:[%s671_s4] ss:$0 sm:$0xff] }
  0x22   :  { %435 = vmatpush3.msra.mxu0 %v82_v4  ;;  %443 = vmatprep.subr.mxu1 %v517_v0  ;;  %v410_v57 = vld [vmem:[%s672_s5] ss:$0 sm:$0xff] }
  0x23   :  { %444 = vmatpush3.msra.mxu1 %v232_v24  ;;  %v411_v62 = vld [vmem:[%s674_s7] ss:$0 sm:$0xff] }
  0x24   :  { %445 = vmatprep.subr.mxu1 %v517_v0 }
  0x25   :  { %446 = vmatpush3.msra.mxu1 %v231_v25 }
  0x26   :  { %447 = vmatprep.subr.mxu1 %v517_v0 }
  0x27   :  { %448 = vmatpush3.msra.mxu1 %v230_v26 }
  0x28   :  { %449 = vmatprep.subr.mxu1 %v517_v0 }
  0x29   :  { %450 = vmatpush3.msra.mxu1 %v229_v27 }
  0x2a   :  { %451 = vmatprep.subr.mxu1 %v517_v0 }
  0x2b   :  { %452 = vmatpush3.msra.mxu1 %v228_v28 }
  0x2c   :  { %453 = vmatprep.subr.mxu1 %v517_v0 }
  0x2d   :  { %454 = vmatpush3.msra.mxu1 %v227_v29 }
  0x90   :  { %v78_v6 = vpop.permute.xlu0 %77 }
  0x91   :  { %v81_v7 = vsel %vm80_vm2, %v74_v5, %v78_v6 }
  0x92   :  { %437 = vmatmul.mubr.msk.f32.vlgmr.msra.gmra.mxu0 %vm92_vm3, %v81_v7 }
 0x152   :  { %v166_v11 = vpop.f32.mrf.mxu0 }
 0x153   :  { %v609_v13 = vadd.f32 %v406_v10, %v166_v11 }
 0x154   :  { %v438_v14 = vpop.f32.mrf.mxu0 }
 0x155   :  { %v177_v15 = vsel %vm173_vm5, %v609_v13, 0.0  ;;  %v172_v16 = vmul.f32 %v607_v12, %v609_v13  ;;  %v180_v17 = vmul.f32 %v609_v13, %v609_v13 }
 0x156   :  { %178 = vadd.xlane.f32.xlu1 %v177_v15 }
 0x157   :  { %v174_v18 = vsel %vm173_vm5, %v172_v16, 0.0  ;;  %v181_v19 = vmul.f32 %v607_v12, %v180_v17  ;;  %v185_v21 = vsel %vm173_vm5, %v180_v17, 0.0 }
 0x158   :  { %175 = vadd.xlane.f32.xlu0 %v174_v18 }
 0x159   :  { %v182_v20 = vsel %vm173_vm5, %v181_v19, 0.0 }
 0x15a   :  { %183 = vadd.xlane.f32.xlu1 %v182_v20 }
 0x15e   :  { %186 = vadd.xlane.f32.xlu1 %v185_v21 }
 0x1df   :  { %v179_v30 = vpop.xlane.xlu1 %178 }
 0x1e1   :  { %v176_v31 = vpop.xlane.xlu0 %175 }
 0x1e2   :  { %v188_v32 = vmul.f32 0.03125, %v176_v31  ;;  %v189_v33 = vsub.f32 %v179_v30, %v176_v31 }
 0x1e3   :  { %v184_v34 = vpop.xlane.xlu1 %183 }
 0x1e4   :  { %v190_v35 = vmul.f32 0.03125, %v189_v33  ;;  %v194_v36 = vmul.f32 %v188_v32, %v188_v32  ;;  %v191_v37 = vmul.f32 0.03125, %v184_v34  ;;  %v413_v33 = vld [vmem:[%s675_s8] ss:$0 sm:$0xff] }
 0x1e6   :  { %v195_v40 = vsub.f32 %v191_v37, %v194_v36  ;;  %v197_v42 = vmul.f32 %v190_v35, %v190_v35  ;;  %v200_v50 = vsub.f32 %v188_v32, %v190_v35  ;;  %v414_v37 = vld [vmem:[%s676_s9] ss:$0 sm:$0xff] }
 0x1e7   :  { %v187_v38 = vpop.xlane.xlu1 %186 }
 0x1e8   :  { %v192_v39 = vsub.f32 %v187_v38, %v184_v34  ;;  %v196_v44 = vmax.f32 %v195_v40, 0.0  ;;  %v201_v51 = vmul.f32 %v607_v12, %v200_v50 }
 0x1ea   :  { %v193_v41 = vmul.f32 0.03125, %v192_v39  ;;  %v202_v52 = vadd.f32 %v201_v51, %v190_v35 }
 0x1ec   :  { %v198_v43 = vsub.f32 %v193_v41, %v197_v42  ;;  %v208_v55 = vsub.f32 %v609_v13, %v202_v52  ;;  %v415_v41 = vld [vmem:[%s677_s10] ss:$0 sm:$0xff] }
 0x1ee   :  { %v199_v45 = vmax.f32 %v198_v43, 0.0 }
 0x1f0   :  { %v203_v46 = vsub.f32 %v196_v44, %v199_v45 }
 0x1f2   :  { %v204_v47 = vmul.f32 %v607_v12, %v203_v46 }
 0x1f4   :  { %v205_v48 = vadd.f32 %v204_v47, %v199_v45 }
 0x1f6   :  { %v206_v49 = vadd.f32 1e-05, %v205_v48 }
 0x1f8   :  { %465 = vrsqrt.f32 %v206_v49  ;;  %v416_v49 = vld [vmem:[%s678_s11] ss:$0 sm:$0xff] }
 0x205   :  { %v466_v54 = vpop.eup %465 }
 0x206   :  { %v215_v56 = vmul.f32 %v466_v54, %v409_v53 }
 0x208   :  { %v216_v58 = vmul.f32 %v215_v56, %v208_v55 }
 0x20a   :  { %v223_v59 = vadd.f32 %v410_v57, %v216_v58 }
 0x20c   :  { %vm224_vm6 = vcmp.gt.f32.partialorder %v223_v59, 0.0  ;;  %v225_v60 = vmul.f32 0.01, %v223_v59 }
 0x20e   :  { %v226_v61 = vsel %vm224_vm6, %v223_v59, %v225_v60 }
 0x20f   :  { %456 = vmatmul.mubr.msk.f32.vlgmr.msra.gmra.mxu1 %vm173_vm5, %v226_v61 }
 0x2cf   :  { %v311_v63 = vpop.f32.mrf.mxu1 }
 0x2d0   :  { %v312_v0 = vadd.f32 %v411_v62, %v311_v63 }
 0x2d1   :  { %v457_v1 = vpop.f32.mrf.mxu1 }
 0x2d2   :  { %v321_v2 = vsel %vm173_vm5, %v312_v0, 0.0  ;;  %v317_v3 = vmul.f32 %v607_v12, %v312_v0  ;;  %v324_v4 = vmul.f32 %v312_v0, %v312_v0 }
 0x2d3   :  { %322 = vadd.xlane.f32.xlu1 %v321_v2 }
 0x2d4   :  { %v318_v5 = vsel %vm173_vm5, %v317_v3, 0.0  ;;  %v325_v6 = vmul.f32 %v607_v12, %v324_v4  ;;  %v329_v8 = vsel %vm173_vm5, %v324_v4, 0.0 }
 0x2d6   :  { %v326_v7 = vsel %vm173_vm5, %v325_v6, 0.0 }
 0x2d7   :  { %319 = vadd.xlane.f32.xlu1 %v318_v5 }
 0x2db   :  { %327 = vadd.xlane.f32.xlu1 %v326_v7 }
 0x2df   :  { %330 = vadd.xlane.f32.xlu1 %v329_v8 }
 0x35c   :  { %v323_v9 = vpop.xlane.xlu1 %322 }
 0x360   :  { %v320_v10 = vpop.xlane.xlu1 %319 }
 0x361   :  { %v333_v11 = vsub.f32 %v323_v9, %v320_v10  ;;  %v332_v14 = vmul.f32 0.03125, %v320_v10 }
 0x363   :  { %v334_v15 = vmul.f32 0.03125, %v333_v11  ;;  %v338_v18 = vmul.f32 %v332_v14, %v332_v14 }
 0x364   :  { %v328_v13 = vpop.xlane.xlu1 %327 }
 0x365   :  { %v335_v16 = vmul.f32 0.03125, %v328_v13  ;;  %v341_v21 = vmul.f32 %v334_v15, %v334_v15  ;;  %v344_v30 = vsub.f32 %v332_v14, %v334_v15 }
 0x367   :  { %v339_v20 = vsub.f32 %v335_v16, %v338_v18  ;;  %v345_v31 = vmul.f32 %v607_v12, %v344_v30 }
 0x368   :  { %v331_v17 = vpop.xlane.xlu1 %330 }
 0x369   :  { %v336_v19 = vsub.f32 %v331_v17, %v328_v13  ;;  %v340_v24 = vmax.f32 %v339_v20, 0.0  ;;  %v346_v32 = vadd.f32 %v345_v31, %v334_v15 }
 0x36b   :  { %v337_v22 = vmul.f32 0.03125, %v336_v19  ;;  %v352_v35 = vsub.f32 %v312_v0, %v346_v32 }
 0x36d   :  { %v342_v23 = vsub.f32 %v337_v22, %v341_v21 }
 0x36f   :  { %v343_v25 = vmax.f32 %v342_v23, 0.0 }
 0x371   :  { %v347_v26 = vsub.f32 %v340_v24, %v343_v25 }
 0x373   :  { %v348_v27 = vmul.f32 %v607_v12, %v347_v26 }
 0x375   :  { %v349_v28 = vadd.f32 %v348_v27, %v343_v25 }
 0x377   :  { %v350_v29 = vadd.f32 1e-05, %v349_v28 }
 0x379   :  { %467 = vrsqrt.f32 %v350_v29 }
 0x386   :  { %v468_v34 = vpop.eup %467 }
 0x387   :  { %v359_v36 = vmul.f32 %v468_v34, %v413_v33 }
 0x389   :  { %v360_v38 = vmul.f32 %v359_v36, %v352_v35 }
 0x38b   :  { %v367_v39 = vadd.f32 %v414_v37, %v360_v38 }
 0x38d   :  { %vm368_vm7 = vcmp.gt.f32.partialorder %v367_v39, 0.0  ;;  %v369_v40 = vmul.f32 0.01, %v367_v39 }
 0x38f   :  { %v370_v42 = vsel %vm368_vm7, %v367_v39, %v369_v40 }
 0x390   :  { %v378_v43 = vmul.f32 %v415_v41, %v370_v42 }
 0x392   :  { %v379_v44 = vmul.f32 %v607_v12, %v378_v43  ;;  %v383_v46 = vsel %vm173_vm5, %v378_v43, 0.0 }
 0x394   :  { %v380_v45 = vsel %vm173_vm5, %v379_v44, 0.0 }
 0x395   :  { %381 = vadd.xlane.f32.xlu1 %v380_v45 }
 0x399   :  { %384 = vadd.xlane.f32.xlu1 %v383_v46 }
 0x41e   :  { %v382_v47 = vpop.xlane.xlu1 %381 }
 0x422   :  { %v385_v48 = vpop.xlane.xlu1 %384 }
 0x423   :  { %v386_v50 = vsub.f32 %v385_v48, %v382_v47 }
 0x425   :  { %v388_v51 = vsel %vm387_vm8, %v382_v47, %v386_v50 }
 0x426   :  { %v396_v52 = vadd.f32 %v416_v49, %v388_v51 }
 0x428   :  { %398 = vst.msk [vmem:[%s679_s12] sm:$0xff] %vm397_vm9, %v396_v52 }
 0x429   :  { %403 = vsyncpa [#allocation3], 1 }
 0x42a   :  { %404 = vsyncpa [#allocation5], 1 }

</bundles_post_ra>
